<compile_context>
chip_gen: v5e
topology: v5e:2x2
jax: 0.10.0
libtpu: 0.0.40
codegen_flags: <defaults>
</compile_context>

<pallas_src>
import functools

import numpy as np
import jax
import jax.numpy as jnp
from jax.experimental import pallas as pl
from jax.experimental.pallas import tpu as pltpu


# --------------------------------------------------------------------------
# Kernels
# --------------------------------------------------------------------------
def _cfg_combine_kernel(w_ref, coef_ref, cond_ref, uncond_ref, out_ref):
    """combine_denoised only (txt2img fast path: self.mask is None).

    w_ref     : SMEM (B*Nc,)       weights already multiplied by cond_scale
    coef_ref  : SMEM (B,)          1 - cond_scale * rowsum_i
    cond_ref  : VMEM (Nc, TS, 128) cond predictions tile (shared across batch)
    uncond_ref: VMEM (1, TS, 128)  uncond prediction tile for image b
    out_ref   : VMEM (1, TS, 128)  aliased with the uncond input buffer
    """
    b = pl.program_id(1)
    nc = cond_ref.shape[0]

    # denoised[i] = (1 - cs*rowsum_i)*uncond[i] + sum_j (cs*w_ij)*cond[j]
    acc = coef_ref[b] * uncond_ref[0].astype(jnp.float32)
    for j in range(nc):                       # Nc is tiny -> unrolled VPU FMAs
        acc = acc + w_ref[b * nc + j] * cond_ref[j].astype(jnp.float32)
    out_ref[0] = acc.astype(out_ref.dtype)


def _cfg_combine_blend_kernel(w_ref, coef_ref, cond_ref, uncond_ref,
                              mask_ref, init_ref, out_ref):
    """combine_denoised + apply_blend (mask_before_denoising == False path)."""
    b = pl.program_id(1)
    nc = cond_ref.shape[0]

    acc = coef_ref[b] * uncond_ref[0].astype(jnp.float32)
    for j in range(nc):
        acc = acc + w_ref[b * nc + j] * cond_ref[j].astype(jnp.float32)

    # apply_blend; nmask == 1 - mask in the standard webui inpainting setup.
    # TODO(synk): soft-inpainting callers whose nmask != 1 - mask must pass
    # nmask explicitly instead of it being recomputed here.
    m = mask_ref[0].astype(jnp.float32)
    blended = acc * (1.0 - m) + init_ref[0].astype(jnp.float32) * m
    out_ref[0] = blended.astype(out_ref.dtype)


# --------------------------------------------------------------------------
# Host-side helpers (cached)
# --------------------------------------------------------------------------
_WEIGHT_CACHE = {}


def _get_weights(conds_list, cond_scale, n_cond):
    """Flat scaled weight vector (B*Nc,) + per-image uncond coefficient (B,)."""
    key = (tuple(tuple((int(ci), float(wt)) for ci, wt in conds)
                 for conds in conds_list),
           float(cond_scale), int(n_cond))
    hit = _WEIGHT_CACHE.get(key)
    if hit is None:
        batch = len(conds_list)
        w = np.zeros((batch, n_cond), dtype=np.float32)
        for i, conds in enumerate(conds_list):
            for cond_index, weight in conds:
                w[i, cond_index] += weight
        w_scaled = (w * float(cond_scale)).astype(np.float32)
        coef = (1.0 - w_scaled.sum(axis=1)).astype(np.float32)
        hit = (jnp.asarray(w_scaled.reshape(-1)), jnp.asarray(coef))
        _WEIGHT_CACHE[key] = hit
    return hit


def _pick_tile_and_vmem(f_sub, n_cond, itemsize, has_mask):
    """F-tile size (sublanes, multiple of 8) and an explicit VMEM limit.

    Chooses the largest tile such that (a) the double-buffered streamed
    operands + a few f32 tile-sized intermediates fit a 32 MiB budget and
    (b) the F axis keeps >= ~4 grid steps, so the BlockSpec pipeline has
    read/write overlap and both v7x TensorCores get work even for batch == 1.
    No divisibility requirement: the grid uses pl.cdiv (ragged last block).
    """
    n_stream = n_cond + (4 if has_mask else 2)   # cond rows + uncond + out (+mask+init)
    # bytes per tile sublane: native-dtype streamed blocks, double-buffered,
    # plus ~4 f32 tile-sized in-register / spill intermediates.
    per_sublane = n_stream * 128 * itemsize * 2 + 4 * 128 * 4
    budget = 32 * 1024 * 1024
    cap = max(8, budget // per_sublane)
    min_steps = 4                                # pipeline overlap + 2 v7x cores
    cap = min(cap, 512, max(8, f_sub // min_steps))
    ts = max(8, (cap // 8) * 8)
    ts = min(ts, f_sub)
    vmem_need = ts * per_sublane
    vmem_limit = int(min(48 * 1024 * 1024,
                         max(16 * 1024 * 1024, vmem_need + 4 * 1024 * 1024)))
    return ts, vmem_limit


@functools.lru_cache(maxsize=None)
def _build_cfg_call(n_cond, ts, has_mask, vmem_limit_bytes, donate):
    """Build (and cache) a jitted wrapper around the pallas_call."""

    def impl(w_flat, coef, x_out, mask, init_latent):
        total, C, H, W = x_out.shape
        batch = total - n_cond
        F = C * H * W
        f_pad = (-F) % 1024                       # pad to lane+sublane dense
        Fp = F + f_pad
        f_sub = Fp // 128
        dtype = x_out.dtype

        flat = x_out.reshape(total, F)
        if f_pad:
            flat = jnp.pad(flat, ((0, 0), (0, f_pad)))
        cond_r = flat[:n_cond].reshape(n_cond, f_sub, 128)
        uncond_r = flat[n_cond:].reshape(batch, f_sub, 128)

        operands = [w_flat, coef, cond_r, uncond_r]
        in_specs = [
            pl.BlockSpec(memory_space=pltpu.MemorySpace.SMEM),        # w_flat
            pl.BlockSpec(memory_space=pltpu.MemorySpace.SMEM),        # coef
            pl.BlockSpec((n_cond, ts, 128), lambda t, b: (0, t, 0)),  # cond
            pl.BlockSpec((1, ts, 128), lambda t, b: (b, t, 0)),       # uncond
        ]
        isz = np.dtype(dtype).itemsize
        bytes_accessed = n_cond * Fp * isz + 2 * batch * Fp * isz
        flops_per_elem = 2 * n_cond + 2

        if has_mask:
            mflat = mask.reshape(batch, F)
            iflat = init_latent.reshape(batch, F)
            if f_pad:
                mflat = jnp.pad(mflat, ((0, 0), (0, f_pad)))
                iflat = jnp.pad(iflat, ((0, 0), (0, f_pad)))
            operands += [mflat.reshape(batch, f_sub, 128),
                         iflat.reshape(batch, f_sub, 128)]
            in_specs += [pl.BlockSpec((1, ts, 128), lambda t, b: (b, t, 0)),
                         pl.BlockSpec((1, ts, 128), lambda t, b: (b, t, 0))]
            bytes_accessed += batch * Fp * (np.dtype(mask.dtype).itemsize
                                            + np.dtype(init_latent.dtype).itemsize)
            flops_per_elem += 4
            kernel = _cfg_combine_blend_kernel
        else:
            kernel = _cfg_combine_kernel

        num_t = pl.cdiv(f_sub, ts)                # ragged last block is fine
        cost = pl.CostEstimate(flops=int(batch * Fp * flops_per_elem),
                               transcendentals=0,
                               bytes_accessed=int(bytes_accessed))

        out = pl.pallas_call(
            kernel,
            out_shape=jax.ShapeDtypeStruct((batch, f_sub, 128), dtype),
            grid=(num_t, batch),
            in_specs=in_specs,
            out_specs=pl.BlockSpec((1, ts, 128), lambda t, b: (b, t, 0)),
            compiler_params=pltpu.CompilerParams(
                # Both axes shardable across v7x TensorCores; the cond tile is
                # tiny relative to the per-core byte savings.
                dimension_semantics=("parallel", "parallel"),
                vmem_limit_bytes=vmem_limit_bytes),
            # reuse the uncond buffer for the output (no extra allocation)
            input_output_aliases={3: 0},
            cost_estimate=cost,
        )(*operands)

        out = out.reshape(batch, Fp)
        if f_pad:
            out = out[:, :F]
        return out.reshape(batch, C, H, W)

    donate_argnums = (2,) if donate else ()
    return jax.jit(impl, donate_argnums=donate_argnums)


def cfg_denoiser_combine(x_out, conds_list, cond_scale,
                         mask=None, init_latent=None, *, donate_x_out=False):
    """x_out: (Nc + B, C, H, W) stacked [cond outputs..., uncond outputs].

    Implements the standard (non-edit-model, no skip_uncond) combine_denoised,
    followed by the mask_before_denoising=False apply_blend when `mask` is
    given.  Set donate_x_out=True if the caller no longer needs x_out, so XLA
    can reuse its HBM for the kernel output (the uncond slice is clobbered).
    """
    # TODO(synk): is_edit_model / skip_uncond / mask_before_denoising=True
    # branches of forward() use different formulas and are not covered here.
    batch = len(conds_list)
    n_cond = x_out.shape[0] - batch
    C, H, W = x_out.shape[1:]
    F = C * H * W
    has_mask = mask is not None
    if has_mask and init_latent is None:
        raise ValueError("init_latent must be provided together with mask")

    w_flat, coef = _get_weights(conds_list, cond_scale, n_cond)
    f_sub = (F + (-F) % 1024) // 128
    ts, vmem_limit = _pick_tile_and_vmem(
        f_sub, n_cond, np.dtype(x_out.dtype).itemsize, has_mask)
    fn = _build_cfg_call(n_cond, ts, has_mask, vmem_limit, bool(donate_x_out))
    return fn(w_flat, coef, x_out, mask, init_latent)


# --------------------------------------------------------------------------
# Self-test
# --------------------------------------------------------------------------
if __name__ == "__main__":
    def _reference(x_out_np, conds_list, cond_scale, mask_np=None, init_np=None):
        B = len(conds_list)
        denoised_uncond = x_out_np[-B:]
        ref = denoised_uncond.copy()
        for i, conds in enumerate(conds_list):
            for cond_index, weight in conds:
                ref[i] += (x_out_np[cond_index] - denoised_uncond[i]) * (weight * cond_scale)
        if mask_np is not None:
            ref = ref * (1.0 - mask_np) + init_np * mask_np
        return ref

    key = jax.random.PRNGKey(0)

    # --- Test 1: img2img inpainting path (mask blend), B=2, AND prompt -----
    B, C, H, W = 2, 4, 16, 16
    conds_list = [[(0, 0.7), (1, 0.3)], [(2, 1.0)]]
    repeats = [len(c) for c in conds_list]
    cond_scale = 7.5

    k1, k2, k3, k4 = jax.random.split(key, 4)
    x = jax.random.normal(k1, (B, C, H, W), jnp.float32)
    sigma = jnp.abs(jax.random.normal(k2, (B,), jnp.float32)) + 0.5
    init_latent = jax.random.normal(k3, (B, C, H, W), jnp.float32)
    mask = (jax.random.uniform(k4, (B, C, H, W)) > 0.5).astype(jnp.float32)

    # forward preamble (glue, mirrors the module): replicate x / sigma per
    # conds_list repeats, append the uncond copies.
    x_in = jnp.concatenate(
        [jnp.stack([x[i]] * n) for i, n in enumerate(repeats)] + [x], axis=0)
    sigma_in = jnp.concatenate(
        [jnp.stack([sigma[i]] * n) for i, n in enumerate(repeats)] + [sigma],
        axis=0)

    # TODO(synk): self.inner_model is an external UNet (NotImplementedError in
    # this module); use a deterministic surrogate so the CFG combine / blend
    # hot path (the module's own math) can be exercised end-to-end.
    x_out = x_in / (sigma_in[:, None, None, None] ** 2 + 1.0)

    x_out_np = np.asarray(x_out)
    mask_np = np.asarray(mask)
    init_np = np.asarray(init_latent)

    denoised = cfg_denoiser_combine(x_out, conds_list, cond_scale,
                                    mask, init_latent)
    denoised = jax.block_until_ready(denoised)
    ref = _reference(x_out_np, conds_list, cond_scale, mask_np, init_np)
    assert np.allclose(np.asarray(denoised), ref, rtol=1e-4, atol=1e-4), \
        "mismatch vs reference (mask path)"

    # --- Test 2: txt2img fast path (mask is None) ---------------------------
    denoised2 = cfg_denoiser_combine(x_out, conds_list, cond_scale)
    denoised2 = jax.block_until_ready(denoised2)
    ref2 = _reference(x_out_np, conds_list, cond_scale)
    assert np.allclose(np.asarray(denoised2), ref2, rtol=1e-4, atol=1e-4), \
        "mismatch vs reference (mask-less fast path)"

    # --- Test 3: latent with C*H*W not a multiple of 128 (padded path) -----
    k5 = jax.random.PRNGKey(1)
    conds_list3 = [[(0, 1.0)]]
    x_out3 = jax.random.normal(k5, (2, 3, 6, 7), jnp.float32)   # Nc=1, B=1, F=126
    x_out3_np = np.asarray(x_out3)
    denoised3 = cfg_denoiser_combine(x_out3, conds_list3, cond_scale)
    denoised3 = jax.block_until_ready(denoised3)
    ref3 = _reference(x_out3_np, conds_list3, cond_scale)
    assert np.allclose(np.asarray(denoised3), ref3, rtol=1e-4, atol=1e-4), \
        "mismatch vs reference (padded F path)"

    print("KERNEL_OK")
</pallas_src>

<mosaic_0001>
module attributes {stable_mosaic.version = 11 : i64} {
  func.func @_cfg_combine_blend_kernel(%arg0: i32, %arg1: i32, %arg2: memref<6xf32, #tpu.memory_space<smem>>, %arg3: memref<2xf32, #tpu.memory_space<smem>>, %arg4: memref<3x8x128xf32, #tpu.memory_space<vmem>>, %arg5: memref<1x8x128xf32, #tpu.memory_space<vmem>>, %arg6: memref<1x8x128xf32, #tpu.memory_space<vmem>>, %arg7: memref<1x8x128xf32, #tpu.memory_space<vmem>>, %arg8: memref<1x8x128xf32, #tpu.memory_space<vmem>>) attributes {dimension_semantics = [#tpu.dimension_semantics<parallel>, #tpu.dimension_semantics<parallel>], iteration_bounds = array<i64: 1, 2>, scalar_prefetch = 0 : i64, scratch_operands = 0 : i64, tpu.core_type = #tpu.core_type<tc>, window_params = [{transform_indices = @transform_0, window_bounds = array<i64: 6>}, {transform_indices = @transform_1, window_bounds = array<i64: 2>}, {transform_indices = @transform_2, window_bounds = array<i64: 3, 8, 128>}, {transform_indices = @transform_3, window_bounds = array<i64: 1, 8, 128>}, {transform_indices = @transform_4, window_bounds = array<i64: 1, 8, 128>}, {transform_indices = @transform_5, window_bounds = array<i64: 1, 8, 128>}, {transform_indices = @transform_6, window_bounds = array<i64: 1, 8, 128>}]} {
    %0 = arith.index_cast %arg1 : i32 to index
    %1 = memref.load %arg3[%0] : memref<2xf32, #tpu.memory_space<smem>>
    %c0 = arith.constant 0 : index
    %c0_0 = arith.constant 0 : index
    %c0_1 = arith.constant 0 : index
    %2 = vector.load %arg5[%c0, %c0_0, %c0_1] : memref<1x8x128xf32, #tpu.memory_space<vmem>>, vector<1x8x128xf32>
    %3 = vector.shape_cast %2 : vector<1x8x128xf32> to vector<8x128xf32>
    %4 = vector.broadcast %1 : f32 to vector<8x128xf32>
    %5 = arith.mulf %4, %3 : vector<8x128xf32>
    %c3_i32 = arith.constant 3 : i32
    %6 = arith.muli %arg1, %c3_i32 : i32
    %c0_i32 = arith.constant 0 : i32
    %7 = arith.addi %6, %c0_i32 : i32
    %8 = arith.index_cast %7 : i32 to index
    %9 = memref.load %arg2[%8] : memref<6xf32, #tpu.memory_space<smem>>
    %c0_2 = arith.constant 0 : index
    %c0_3 = arith.constant 0 : index
    %c0_4 = arith.constant 0 : index
    %10 = vector.load %arg4[%c0_2, %c0_3, %c0_4] : memref<3x8x128xf32, #tpu.memory_space<vmem>>, vector<1x8x128xf32>
    %11 = vector.shape_cast %10 : vector<1x8x128xf32> to vector<8x128xf32>
    %12 = vector.broadcast %9 : f32 to vector<8x128xf32>
    %13 = arith.mulf %12, %11 : vector<8x128xf32>
    %14 = arith.addf %5, %13 : vector<8x128xf32>
    %c3_i32_5 = arith.constant 3 : i32
    %15 = arith.muli %arg1, %c3_i32_5 : i32
    %c1_i32 = arith.constant 1 : i32
    %16 = arith.addi %15, %c1_i32 : i32
    %17 = arith.index_cast %16 : i32 to index
    %18 = memref.load %arg2[%17] : memref<6xf32, #tpu.memory_space<smem>>
    %c1 = arith.constant 1 : index
    %c0_6 = arith.constant 0 : index
    %c0_7 = arith.constant 0 : index
    %19 = vector.load %arg4[%c1, %c0_6, %c0_7] : memref<3x8x128xf32, #tpu.memory_space<vmem>>, vector<1x8x128xf32>
    %20 = vector.shape_cast %19 : vector<1x8x128xf32> to vector<8x128xf32>
    %21 = vector.broadcast %18 : f32 to vector<8x128xf32>
    %22 = arith.mulf %21, %20 : vector<8x128xf32>
    %23 = arith.addf %14, %22 : vector<8x128xf32>
    %c3_i32_8 = arith.constant 3 : i32
    %24 = arith.muli %arg1, %c3_i32_8 : i32
    %c2_i32 = arith.constant 2 : i32
    %25 = arith.addi %24, %c2_i32 : i32
    %26 = arith.index_cast %25 : i32 to index
    %27 = memref.load %arg2[%26] : memref<6xf32, #tpu.memory_space<smem>>
    %c2 = arith.constant 2 : index
    %c0_9 = arith.constant 0 : index
    %c0_10 = arith.constant 0 : index
    %28 = vector.load %arg4[%c2, %c0_9, %c0_10] : memref<3x8x128xf32, #tpu.memory_space<vmem>>, vector<1x8x128xf32>
    %29 = vector.shape_cast %28 : vector<1x8x128xf32> to vector<8x128xf32>
    %30 = vector.broadcast %27 : f32 to vector<8x128xf32>
    %31 = arith.mulf %30, %29 : vector<8x128xf32>
    %32 = arith.addf %23, %31 : vector<8x128xf32>
    %c0_11 = arith.constant 0 : index
    %c0_12 = arith.constant 0 : index
    %c0_13 = arith.constant 0 : index
    %33 = vector.load %arg6[%c0_11, %c0_12, %c0_13] : memref<1x8x128xf32, #tpu.memory_space<vmem>>, vector<1x8x128xf32>
    %34 = vector.shape_cast %33 : vector<1x8x128xf32> to vector<8x128xf32>
    %cst = arith.constant 1.000000e+00 : f32
    %35 = vector.broadcast %cst : f32 to vector<8x128xf32>
    %36 = arith.subf %35, %34 : vector<8x128xf32>
    %37 = arith.mulf %32, %36 : vector<8x128xf32>
    %c0_14 = arith.constant 0 : index
    %c0_15 = arith.constant 0 : index
    %c0_16 = arith.constant 0 : index
    %38 = vector.load %arg7[%c0_14, %c0_15, %c0_16] : memref<1x8x128xf32, #tpu.memory_space<vmem>>, vector<1x8x128xf32>
    %39 = vector.shape_cast %38 : vector<1x8x128xf32> to vector<8x128xf32>
    %40 = arith.mulf %39, %34 : vector<8x128xf32>
    %41 = arith.addf %37, %40 : vector<8x128xf32>
    %c0_17 = arith.constant 0 : index
    %c0_18 = arith.constant 0 : index
    %c0_19 = arith.constant 0 : index
    %42 = vector.load %arg8[%c0_17, %c0_18, %c0_19] : memref<1x8x128xf32, #tpu.memory_space<vmem>>, vector<1x8x128xf32>
    %43 = vector.shape_cast %42 : vector<1x8x128xf32> to vector<8x128xf32>
    %44 = vector.shape_cast %41 : vector<8x128xf32> to vector<1x8x128xf32>
    tpu.vector_store %arg8[%c0_17, %c0_18, %c0_19], %44 {strides = array<i32>} : memref<1x8x128xf32, #tpu.memory_space<vmem>>, vector<1x8x128xf32>,
    return
  }
  func.func @transform_0(%arg0: i32, %arg1: i32) -> i32 {
    %c0_i32 = arith.constant 0 : i32
    %c0_i32_0 = arith.constant 0 : i32
    return %c0_i32 : i32
  }
  func.func @transform_1(%arg0: i32, %arg1: i32) -> i32 {
    %c0_i32 = arith.constant 0 : i32
    %c0_i32_0 = arith.constant 0 : i32
    return %c0_i32 : i32
  }
  func.func @transform_2(%arg0: i32, %arg1: i32) -> (i32, i32, i32) {
    %c0_i32 = arith.constant 0 : i32
    %c0_i32_0 = arith.constant 0 : i32
    %c0_i32_1 = arith.constant 0 : i32
    return %c0_i32, %arg0, %c0_i32_0 : i32, i32, i32
  }
  func.func @transform_3(%arg0: i32, %arg1: i32) -> (i32, i32, i32) {
    %c0_i32 = arith.constant 0 : i32
    %c0_i32_0 = arith.constant 0 : i32
    return %arg1, %arg0, %c0_i32 : i32, i32, i32
  }
  func.func @transform_4(%arg0: i32, %arg1: i32) -> (i32, i32, i32) {
    %c0_i32 = arith.constant 0 : i32
    %c0_i32_0 = arith.constant 0 : i32
    return %arg1, %arg0, %c0_i32 : i32, i32, i32
  }
  func.func @transform_5(%arg0: i32, %arg1: i32) -> (i32, i32, i32) {
    %c0_i32 = arith.constant 0 : i32
    %c0_i32_0 = arith.constant 0 : i32
    return %arg1, %arg0, %c0_i32 : i32, i32, i32
  }
  func.func @transform_6(%arg0: i32, %arg1: i32) -> (i32, i32, i32) {
    %c0_i32 = arith.constant 0 : i32
    %c0_i32_0 = arith.constant 0 : i32
    return %arg1, %arg0, %c0_i32 : i32, i32, i32
  }
}

</mosaic_0001>

<bundles_post_ra>
// kernel: impl.1
= control target key start
LH: loop header
LB: loop body
LE: loop exit
PB: predicated region body
PF: predicated region fallthrough
CT: control target
= control target key end

     0   :  { %11 = vsyncpa [#allocation3], 0  ;;  %s794_s0 = inlined_call_operand.vmem [shape: f32[6], index: 0, kind: input, shape index: {}]   ;;  %s795_s1 = inlined_call_operand.vmem [shape: f32[2], index: 1, kind: input, shape index: {}]   ;;  %s796_s2 = inlined_call_operand.vmem [shape: f32[3,8,128], index: 2, kind: input, shape index: {}]   ;;  %s797_s3 = inlined_call_operand.vmem [shape: f32[2,8,128], index: 3, kind: input, shape index: {}, may-alias: {3,6}]   ;;  %s798_s4 = inlined_call_operand.vmem [shape: f32[2,8,128], index: 4, kind: input, shape index: {}]   ;;  %s799_s5 = inlined_call_operand.vmem [shape: f32[2,8,128], index: 5, kind: input, shape index: {}]   ;;  %s800_s6 = inlined_call_operand.vmem [shape: f32[2,8,128], index: 6, kind: output, shape index: {}, may-alias: {3,6}]  }
   0x1   :  { %12 = vsyncpa [#allocation5], 0  ;;  %s713_s21 = smov 0   ;;  %s715_s22 = smov 0  }
   0x2   :  { %s717_s23 = smov 0  }
   0x3 LB: > { %s551_s24 = sadd.s32 4294967295, %s674_s23   ;;  %s27_s25 = sadd.s32 1, %s670_s22  ;;  %s674_s23 = sphi %s717_s23, %s18_s23   ;;  %s670_s22 = sphi %s715_s22, %s803_s22   ;;  %s666_s21 = sphi %s713_s21, %s802_s21  }
   0x4   : > { %p28_p0 = scmp.ge.s32.totalorder %s27_s25, 2  ;;  %p553_p1 = scmp.ge.s32.totalorder %s674_s23, 1 }
   0x5   : > { %p215_p2 = scmp.lt.s32.totalorder %s674_s23, 3  ;;  %p734_p4 = scmp.eq.s32.totalorder %s551_s24, 0 }
   0x6   : > { %s805_s25 = smov (%p28_p0, %s27_s25), 0  ;;  %s227_s29 = sshll.u32 %s794_s0, 4  ;;  %s228_s29 = int_to_ptr.vmem [resolvable:$true] %s227_s29 }
   0x7   : > { %p216_p3 = pnand %p553_p1, %p215_p2  ;;  %s237_s8 = sshll.u32 %s795_s1, 4  ;;  %s238_s8 = int_to_ptr.vmem [resolvable:$true] %s237_s8 }
   0x8   : > { %s676_s9 = smov [#allocation2]   ;;  %s677_s10 = smov [#allocation4]  }
   0x9   : > { %p577_p5 = pneg %p216_p3 }
   0xa   : > { %287 = sbr.rel (%p216_p3) target bundleno = 43 (0x2b), region = 44 }
   0xb   : > { %p578_p6 = pnand %p734_p4, %p577_p5 }
   0xd   : > { %580 = dma.vmem_to_smem (!%p578_p6), %s228_s29, 16, %s676_s9, [#allocation3]  }
   0xe   : > { %583 = dma.vmem_to_smem (!%p578_p6), %s238_s8, 16, %s677_s10, [#allocation5]  }
   0xf   : > { %657 = dma.done.wait (%p734_p4), [#allocation3], 16  }
  0x10   : > { %659 = vsyncadd (%p734_p4), [#allocation3], 4294967280 }
  0x11   : > { %661 = dma.done.wait (%p734_p4), [#allocation5], 16  }
  0x12   : > { %663 = vsyncadd (%p734_p4), [#allocation5], 4294967280 }
  0x13   : > { %299 = sfence }
  0x14   : > { %p350_p7 = scmp.lt.s32.totalorder %s666_s21, 1  ;;  %s378_s11 = sld [smem:[#allocation4 + %s666_s21]]  ;;  %v384_v2 = vld [vmem:[%s796_s2] sm:$0xff]  ;;  %v565_v4 = vld [vmem:[%s796_s2 + $0x8] sm:$0xff]  ;;  %v566_v10 = vld [vmem:[%s796_s2 + $0x10] sm:$0xff] }
  0x15   : > { %s382_s12 = smul.u32 3, %s666_s21 }
  0x16   : > { %s807_s21 = smov (!%p350_p7, %s666_s21), 1 }
  0x17   : > { %s383_s13 = sld [smem:[#allocation2 + %s382_s12]]  ;;  %s388_s14 = sadd.s32 1, %s382_s12 }
  0x18   : > { %s758_s15 = sshll.u32 %s807_s21, 3  ;;  %s389_s16 = sld [smem:[#allocation2 + %s388_s14]] }
  0x19   : > { %s356_s19 = scalar_lea.vmem %s797_s3, %s758_s15  ;;  %s395_s26 = sadd.s32 2, %s382_s12 }
  0x1a   : > { %v379_v0 = vld [vmem:[%s356_s19] sm:$0xff]  ;;  %v380_v1 = vstv %s378_s11  ;;  %s396_s21 = sld [smem:[#allocation2 + %s395_s26]]  ;;  %s363_s7 = scalar_lea.vmem %s798_s4, %s758_s15 }
  0x1b   : > { %v381_v3 = vmul.f32 %v380_v1, %v379_v0  ;;  %s370_s10 = scalar_lea.vmem %s799_s5, %s758_s15  ;;  %v402_v11 = vld [vmem:[%s363_s7] sm:$0xff] }
  0x1c   : > { %v405_v14 = vld [vmem:[%s370_s10] sm:$0xff]  ;;  %v403_v16 = vsub.f32 1.0, %v402_v11 }
  0x1d   : > { %v385_v5 = vstv %s383_s13  ;;  %v406_v18 = vmul.f32 %v405_v14, %v402_v11 }
  0x1e   : > { %v386_v6 = vmul.f32 %v385_v5, %v384_v2  ;;  %v392_v7 = vstv %s389_s16  ;;  %s377_s16 = scalar_lea.vmem %s800_s6, %s758_s15 }
  0x1f   : > { %v393_v8 = vmul.f32 %v565_v4, %v392_v7 }
  0x20   : > { %v387_v9 = vadd.f32 %v386_v6, %v381_v3  ;;  %v399_v13 = vstv %s396_s21 }
  0x21   : > { %v400_v15 = vmul.f32 %v566_v10, %v399_v13 }
  0x22   : > { %v394_v12 = vadd.f32 %v393_v8, %v387_v9 }
  0x24   : > { %v401_v17 = vadd.f32 %v400_v15, %v394_v12 }
  0x26   : > { %v404_v19 = vmul.f32 %v403_v16, %v401_v17 }
  0x28   : > { %v407_v20 = vadd.f32 %v406_v18, %v404_v19 }
  0x2a   : > { %408 = vst [vmem:[%s377_s16] sm:$0xff] %v407_v20 }
  0x2b PF: > { %s18_s23 = sadd.s32 1, %s674_s23   ;;  %s802_s21 = smov %s670_s22 }
  0x2c   : > { %p15_p8 = scmp.ge.s32.totalorder %s18_s23, 4   ;;  %s803_s22 = smov %s805_s25 }
  0x2e   :  { %17 = sbr.rel (!%p15_p8) target bundleno = 3 (0x3), region = 94 }
  0x33   :  { %434 = vsyncpa [#allocation3], 1 }
  0x34   :  { %436 = vsyncpa [#allocation3 + $0x1], 1 }
  0x35   :  { %437 = vsyncpa [#allocation5], 1 }

</bundles_post_ra>
